<compile_context>
chip_gen: v5e
topology: v5e:2x2
jax: 0.10.0
libtpu: 0.0.40
codegen_flags: <defaults>
</compile_context>

<pallas_src>
import jax
import jax.numpy as jnp
from jax.experimental import pallas as pl
from jax.experimental.pallas import tpu as pltpu


def _copy_kernel(x_ref, o_ref):
    # Straight tile copy: one vreg-aligned load + unmasked lane-dense store.
    o_ref[...] = x_ref[...]


def _choose_2d_view(total: int) -> tuple[int, int]:
    """Pick a lane-dense (rows, cols) factorization of `total` elements."""
    if total == 0:
        return 1, 1
    if total % 128 != 0:
        # Irregular element count: single full-extent block (allowed because
        # block_shape == full array dims).  Fine for small/odd shapes.
        # TODO(synk): very large arrays with total % 128 != 0 would need a
        # padded / masked tiling scheme instead of one full block.
        return 1, total
    cols = 128
    # Widen the lane dimension (bigger unmasked stores) while keeping at
    # least 8 sublanes of rows and a modest VMEM footprint.
    while total % (cols * 2) == 0 and cols * 2 <= 1024 and (total // (cols * 2)) >= 8:
        cols *= 2
    return total // cols, cols


def _pallas_identity_2d(x2: jax.Array) -> jax.Array:
    """Tiled identity copy of a 2D array through a Pallas kernel."""
    rows, cols = x2.shape
    nbytes = x2.size * jnp.dtype(x2.dtype).itemsize

    if rows <= 1024:
        block_rows = rows           # full extent (always legal)
        grid = (1,)
    else:
        block_rows = 512            # multiple of 8; (512, 128k) tile
        grid = (pl.cdiv(rows, block_rows),)

    return pl.pallas_call(
        _copy_kernel,
        out_shape=jax.ShapeDtypeStruct((rows, cols), x2.dtype),
        grid=grid,
        in_specs=[pl.BlockSpec((block_rows, cols), lambda i: (i, 0))],
        out_specs=pl.BlockSpec((block_rows, cols), lambda i: (i, 0)),
        compiler_params=pltpu.CompilerParams(
            dimension_semantics=("parallel",),
        ),
        cost_estimate=pl.CostEstimate(
            flops=0, transcendentals=0, bytes_accessed=2 * nbytes
        ),
    )(x2)


def unsqueeze(x: jax.Array, dim: int) -> jax.Array:
    """Equivalent of torch.Tensor.unsqueeze(dim), forward pass only."""
    ndim = x.ndim
    # PyTorch allows dim in [-(ndim+1), ndim].
    if not (-(ndim + 1) <= dim <= ndim):
        raise ValueError(f"dim {dim} out of range for unsqueeze of rank {ndim}")
    if dim < 0:
        dim = dim + ndim + 1

    out_shape = x.shape[:dim] + (1,) + x.shape[dim:]

    # Lane-dense 2D view for the kernel (metadata reshape: same linear order).
    rows, cols = _choose_2d_view(x.size)
    x2 = x.reshape(rows, cols)

    y2 = _pallas_identity_2d(x2)

    # The actual unsqueeze: zero-cost metadata reshape (linear order unchanged).
    return y2.reshape(out_shape)


class Unsqueeze:
    """Mirror of the PyTorch module."""

    def __init__(self, dim: int):
        self.dim = dim

    def __call__(self, x: jax.Array) -> jax.Array:
        return unsqueeze(x, self.dim)


if __name__ == "__main__":
    key = jax.random.PRNGKey(0)
    # Small NCHW input consistent with a typical conv-net intermediate.
    x = jax.random.normal(key, (2, 4, 16, 16), dtype=jnp.float32)

    # Module constructed as Unsqueeze(dim); use dim=1 for the primary demo.
    mod = Unsqueeze(1)
    y = jax.block_until_ready(mod(x))

    ref = jnp.expand_dims(x, 1)
    assert y.shape == (2, 1, 4, 16, 16), y.shape
    assert y.dtype == x.dtype
    assert bool(jnp.array_equal(y, ref))

    # Negative dim, as PyTorch allows.
    y2 = jax.block_until_ready(unsqueeze(x, -1))
    assert y2.shape == (2, 4, 16, 16, 1)
    assert bool(jnp.array_equal(y2, jnp.expand_dims(x, -1)))

    # Leading dim (dim=0).
    y3 = jax.block_until_ready(unsqueeze(x, 0))
    assert y3.shape == (1, 2, 4, 16, 16)
    assert bool(jnp.array_equal(y3, jnp.expand_dims(x, 0)))

    print("KERNEL_OK")
</pallas_src>

<mosaic_0001>
module attributes {stable_mosaic.version = 11 : i64} {
  func.func @_copy_kernel(%arg0: i32, %arg1: memref<8x256xf32, #tpu.memory_space<vmem>>, %arg2: memref<8x256xf32, #tpu.memory_space<vmem>>) attributes {dimension_semantics = [#tpu.dimension_semantics<parallel>], iteration_bounds = array<i64: 1>, scalar_prefetch = 0 : i64, scratch_operands = 0 : i64, tpu.core_type = #tpu.core_type<tc>, window_params = [{transform_indices = @transform_0, window_bounds = array<i64: 8, 256>}, {transform_indices = @transform_1, window_bounds = array<i64: 8, 256>}]} {
    %c0 = arith.constant 0 : index
    %c0_0 = arith.constant 0 : index
    %0 = vector.load %arg1[%c0, %c0_0] : memref<8x256xf32, #tpu.memory_space<vmem>>, vector<8x256xf32>
    %c0_1 = arith.constant 0 : index
    %c0_2 = arith.constant 0 : index
    %1 = vector.load %arg2[%c0_1, %c0_2] : memref<8x256xf32, #tpu.memory_space<vmem>>, vector<8x256xf32>
    tpu.vector_store %arg2[%c0_1, %c0_2], %0 {strides = array<i32>} : memref<8x256xf32, #tpu.memory_space<vmem>>, vector<8x256xf32>,
    return
  }
  func.func @transform_0(%arg0: i32) -> (i32, i32) {
    %c0_i32 = arith.constant 0 : i32
    %c0_i32_0 = arith.constant 0 : i32
    return %arg0, %c0_i32 : i32, i32
  }
  func.func @transform_1(%arg0: i32) -> (i32, i32) {
    %c0_i32 = arith.constant 0 : i32
    %c0_i32_0 = arith.constant 0 : i32
    return %arg0, %c0_i32 : i32, i32
  }
}

</mosaic_0001>

<bundles_post_ra>
// kernel: tpu_custom_call.1
= control target key start
LH: loop header
LB: loop body
LE: loop exit
PB: predicated region body
PF: predicated region fallthrough
CT: control target
= control target key end

     0   :  { %6 = vsyncpa [#allocation3], 0  ;;  %s116_s0 = inlined_call_operand.hbm [shape: f32[8,256], index: 0, kind: input, shape index: {}]   ;;  %s117_s1 = inlined_call_operand.hbm [shape: f32[8,256], index: 1, kind: output, shape index: {}]  }
   0x1   :  { %7 = vsyncpa [#allocation4], 0  ;;  %s13_s8 = sshll.u32 %s116_s0, 4  ;;  %s98_s9 = smov [#allocation2]   ;;  %s14_s8 = int_to_ptr.hbm [resolvable:$true] %s13_s8 }
   0x2   :  { %s15_s10 = sshll.u32 %s98_s9, 4  ;;  %s16_s10 = int_to_ptr.vmem [resolvable:$true] %s15_s10 }
   0x3   :  { %18 = dma.hbm_to_vmem [thread:$0]  %s14_s8, 256, %s16_s10, [#allocation3]  }
   0x4   :  { %94 = dma.done.wait [#allocation3], 256  }
   0x5   :  { %95 = vsyncadd [#allocation3], 4294967040  ;;  %s99_s11 = smov [#allocation5]   ;;  %s34_s15 = sshll.u32 %s117_s1, 4  ;;  %v23_v0 = vld [vmem:[#allocation2] sm:$0xff]  ;;  %v24_v1 = vld [vmem:[#allocation2 + $0x8] sm:$0xff]  ;;  %s35_s15 = int_to_ptr.hbm [resolvable:$true] %s34_s15 }
   0x6   :  { %s32_s12 = sshll.u32 %s99_s11, 4  ;;  %25 = vst [vmem:[#allocation5] sm:$0xff] %v23_v0  ;;  %s33_s12 = int_to_ptr.vmem [resolvable:$true] %s32_s12 }
   0x7   :  { %26 = vst [vmem:[#allocation5 + $0x8] sm:$0xff] %v24_v1 }
   0x8   :  { %37 = dma.vmem_to_hbm [thread:$0]  %s33_s12, 256, %s35_s15, [#allocation4]  }
   0x9   :  { %96 = dma.done.wait [#allocation4], 256  }
   0xa   :  { %97 = vsyncadd [#allocation4], 4294967040 }
   0xb   :  { %42 = vsyncpa [#allocation3], 1 }
   0xc   :  { %43 = vsyncpa [#allocation4], 1 }

</bundles_post_ra>
